<compile_context>
chip_gen: v7x
topology: tpu7x:2x2x1
jax: 0.10.0
libtpu: 0.0.40
codegen_flags: <defaults>
</compile_context>

<pallas_src>
import functools

import jax
import jax.numpy as jnp
from jax import lax
from jax.experimental import pallas as pl
from jax.experimental.pallas import tpu as pltpu

EPS = 1e-5


# ---------------------------------------------------------------------------
# Hardware-aware sizing helpers.
# ---------------------------------------------------------------------------

def _vmem_caps():
    """(per-step block budget, vmem_limit_bytes) derived from physical VMEM."""
    try:
        cap = int(getattr(pltpu.get_tpu_info(), "vmem_capacity_bytes",
                          64 * 1024 * 1024))
    except Exception:
        cap = 64 * 1024 * 1024
    block_budget = cap * 5 // 8      # 40 MiB on v7x, 80 MiB on v5e/v6e
    vmem_limit = cap * 3 // 4        # 48 MiB on v7x, 96 MiB on v5e/v6e
    return block_budget, vmem_limit


def _sublane_packing(dtype):
    """Sublane packing per dtype: 8 for f32, 16 for bf16, 32 for int8/fp8."""
    return max(8, 32 // jnp.dtype(dtype).itemsize)


def _footprint_per_elem(itemsize):
    """Bytes of VMEM per block element: 2x(in+out) double buffers + f32 temps."""
    return 4 * itemsize + 8


def _choose_rows(num_rows, bytes_per_row, budget, packing):
    """Largest row tile whose footprint fits budget; prefers dividing num_rows."""
    max_rows = max(1, budget // max(1, bytes_per_row))
    if max_rows >= num_rows:
        return num_rows
    tb = max(packing, (max_rows // packing) * packing)
    tb = min(tb, num_rows)
    cand = tb
    for _ in range(64):                      # best-effort divisor search
        if cand < packing:
            break
        if num_rows % cand == 0:
            return cand
        cand -= packing
    return tb


def _maybe_split_for_megacore(tb, num_rows, data_bytes_per_row, packing):
    """If the grid would have a single step, split it so v7x's 2nd TC has work."""
    if tb == num_rows and num_rows >= 2 * packing:
        half = (num_rows // 2 // packing) * packing
        if half >= packing and half * data_bytes_per_row >= (1 << 20):
            return half
    return tb


# ---------------------------------------------------------------------------
# Instance norm: per-sample stats over (dim1, dim2).
# ---------------------------------------------------------------------------

def _instance_norm_flat_kernel(x_ref, o_ref):
    # x_ref: (TB, N) — TB samples, each flattened lane-dense to N = D1*D2.
    # Single-pass stats (sum & sumsq from one read), centering fused into the
    # final write: 2 VMEM reads + 1 write per block, no block-sized temporaries
    # beyond the f32 upcast.
    x = x_ref[...].astype(jnp.float32)
    inv_n = 1.0 / x.shape[1]
    s = jnp.sum(x, axis=1, keepdims=True)
    ss = jnp.sum(x * x, axis=1, keepdims=True)
    mean = s * inv_n
    var = jnp.maximum(ss * inv_n - mean * mean, 0.0)   # biased (InstanceNorm2d)
    o_ref[...] = ((x - mean) * lax.rsqrt(var + EPS)).astype(o_ref.dtype)


def _instance_partial_kernel(x_ref, part_ref, *, num_cols, col_tile):
    # Phase 1 of the large-plane path: per-row partial [sum, sumsq] over a
    # column tile. part_ref block: (1, TB, 128); lanes 0/1 carry sum/sumsq.
    def write(xv):
        s = jnp.sum(xv, axis=1, keepdims=True)
        ss = jnp.sum(xv * xv, axis=1, keepdims=True)
        lane = lax.broadcasted_iota(jnp.int32, (xv.shape[0], 128), 1)
        part_ref[0] = jnp.where(lane == 0, s, jnp.where(lane == 1, ss, 0.0))

    x = x_ref[...].astype(jnp.float32)
    if num_cols % col_tile == 0:
        write(x)
    else:
        last = pl.num_programs(1) - 1

        @pl.when(pl.program_id(1) != last)
        def _():
            write(x)

        @pl.when(pl.program_id(1) == last)          # only the ragged block masks
        def _():
            cols = last * col_tile + lax.broadcasted_iota(jnp.int32, x.shape, 1)
            write(jnp.where(cols < num_cols, x, 0.0))


def _instance_apply_kernel(scal_ref, x_ref, o_ref):
    # Phase 2: scal_ref (TB, 2) f32 = per-row [mean, inv_std]; x/o: (TB, TC).
    x = x_ref[...].astype(jnp.float32)
    mean = scal_ref[:, 0:1]
    inv = scal_ref[:, 1:2]
    o_ref[...] = ((x - mean) * inv).astype(o_ref.dtype)


def _instance_norm_two_phase(x2d, budget, vmem_limit):
    """Large-plane instance norm: N-tiled partial stats pass + normalize pass."""
    B, N = x2d.shape
    itemsize = x2d.dtype.itemsize
    per_elem = _footprint_per_elem(itemsize)
    tb = B if B <= 64 else 64
    tc = max(128, (budget // max(1, tb * per_elem)) // 128 * 128)
    tc = min(tc, N)
    row_blocks = pl.cdiv(B, tb)
    col_blocks = pl.cdiv(N, tc)
    grid = (row_blocks, col_blocks)

    partials = pl.pallas_call(
        functools.partial(_instance_partial_kernel, num_cols=N, col_tile=tc),
        out_shape=jax.ShapeDtypeStruct((col_blocks, B, 128), jnp.float32),
        grid_spec=pltpu.PrefetchScalarGridSpec(
            num_scalar_prefetch=0,
            grid=grid,
            in_specs=[pl.BlockSpec((tb, tc), lambda i, j: (i, j))],
            out_specs=pl.BlockSpec((1, tb, 128), lambda i, j: (j, i, 0)),
        ),
        compiler_params=pltpu.CompilerParams(
            dimension_semantics=("parallel", "parallel"),
            vmem_limit_bytes=vmem_limit),
        cost_estimate=pl.CostEstimate(
            flops=3 * B * N, transcendentals=0,
            bytes_accessed=B * N * itemsize),
    )(x2d)

    inv_n = 1.0 / N
    mean = jnp.sum(partials[..., 0], axis=0) * inv_n                     # (B,)
    var = jnp.maximum(jnp.sum(partials[..., 1], axis=0) * inv_n - mean * mean, 0.0)
    scal = jnp.stack([mean, lax.rsqrt(var + EPS)], axis=-1).astype(jnp.float32)

    return pl.pallas_call(
        _instance_apply_kernel,
        out_shape=jax.ShapeDtypeStruct((B, N), x2d.dtype),
        grid_spec=pltpu.PrefetchScalarGridSpec(
            num_scalar_prefetch=0,
            grid=grid,
            in_specs=[pl.BlockSpec((tb, 2), lambda i, j: (i, 0)),
                      pl.BlockSpec((tb, tc), lambda i, j: (i, j))],
            out_specs=pl.BlockSpec((tb, tc), lambda i, j: (i, j)),
        ),
        compiler_params=pltpu.CompilerParams(
            dimension_semantics=("parallel", "parallel"),
            vmem_limit_bytes=vmem_limit),
        cost_estimate=pl.CostEstimate(
            flops=2 * B * N, transcendentals=0,
            bytes_accessed=2 * B * N * itemsize),
    )(scal, x2d)


def _normalize_instance(x):
    B, D1, D2 = x.shape
    N = D1 * D2
    budget, vmem_limit = _vmem_caps()
    itemsize = x.dtype.itemsize
    packing = _sublane_packing(x.dtype)
    per_row = N * _footprint_per_elem(itemsize)

    if min(B, packing) * per_row <= budget:
        # Fast path: lane-dense [B, D1*D2], whole samples per row, fused kernel.
        x2d = x.reshape(B, N)
        tb = _choose_rows(B, per_row, budget, packing)
        tb = _maybe_split_for_megacore(tb, B, N * itemsize, packing)
        grid = (pl.cdiv(B, tb),)
        out2d = pl.pallas_call(
            _instance_norm_flat_kernel,
            out_shape=jax.ShapeDtypeStruct((B, N), x.dtype),
            grid_spec=pltpu.PrefetchScalarGridSpec(
                num_scalar_prefetch=0,
                grid=grid,
                in_specs=[pl.BlockSpec((tb, N), lambda i: (i, 0))],
                out_specs=pl.BlockSpec((tb, N), lambda i: (i, 0)),
            ),
            compiler_params=pltpu.CompilerParams(
                dimension_semantics=("parallel",),
                vmem_limit_bytes=vmem_limit),
            cost_estimate=pl.CostEstimate(
                flops=5 * B * N, transcendentals=B,
                bytes_accessed=2 * B * N * itemsize),
        )(x2d)
        return out2d.reshape(B, D1, D2)

    # Planes too large for one row-block: tiled two-phase (reads x twice).
    return _instance_norm_two_phase(x.reshape(B, N), budget,
                                    vmem_limit).reshape(B, D1, D2)


# ---------------------------------------------------------------------------
# Batch norm (train-mode normalization): global stats over all elements.
# Pass 1: per-block partial [sum, sumsq] (parallel, megacore-friendly).
# Pass 2: elementwise normalize with precomputed mean / inv_std.
# ---------------------------------------------------------------------------

def _batch_stats_kernel(x_ref, part_ref, *, num_rows, row_tile):
    # part_ref block: (1, 1, 128); lanes 0/1 carry this block's [sum, sumsq].
    def write(xv):
        s = jnp.sum(xv)
        ss = jnp.sum(xv * xv)
        lane = lax.broadcasted_iota(jnp.int32, (1, 128), 1)
        part_ref[0] = jnp.where(lane == 0, s, jnp.where(lane == 1, ss, 0.0))

    x = x_ref[...].astype(jnp.float32)
    if num_rows % row_tile == 0:
        write(x)
    else:
        last = pl.num_programs(0) - 1

        @pl.when(pl.program_id(0) != last)
        def _():
            write(x)

        @pl.when(pl.program_id(0) == last)          # only the ragged block masks
        def _():
            rows = last * row_tile + lax.broadcasted_iota(jnp.int32, x.shape, 0)
            write(jnp.where(rows < num_rows, x, 0.0))


def _batch_apply_kernel(scal_ref, x_ref, o_ref):
    # scal_ref: SMEM (2,) f32 = [mean, inv_std]; x_ref/o_ref: (TB, C) tiles.
    x = x_ref[...].astype(jnp.float32)
    o_ref[...] = ((x - scal_ref[0]) * scal_ref[1]).astype(o_ref.dtype)


def _batch_norm_2d(x2d, budget, vmem_limit):
    R, C = x2d.shape
    itemsize = x2d.dtype.itemsize
    packing = _sublane_packing(x2d.dtype)
    per_row = C * _footprint_per_elem(itemsize)
    tb = _choose_rows(R, per_row, budget, packing)
    tb = _maybe_split_for_megacore(tb, R, C * itemsize, packing)
    grid = (pl.cdiv(R, tb),)
    nblk = grid[0]

    # Pass 1: per-block partials, fully parallel (both TCs busy on v7x).
    # TODO(synk): E[x^2]-mean^2 in f32 can cancel for |mean| >> std at very
    # large element counts; a Chan-style centered-partial merge would be safer.
    partials = pl.pallas_call(
        functools.partial(_batch_stats_kernel, num_rows=R, row_tile=tb),
        out_shape=jax.ShapeDtypeStruct((nblk, 1, 128), jnp.float32),
        grid_spec=pltpu.PrefetchScalarGridSpec(
            num_scalar_prefetch=0,
            grid=grid,
            in_specs=[pl.BlockSpec((tb, C), lambda i: (i, 0))],
            out_specs=pl.BlockSpec((1, 1, 128), lambda i: (i, 0, 0)),
        ),
        compiler_params=pltpu.CompilerParams(
            dimension_semantics=("parallel",),
            vmem_limit_bytes=vmem_limit),
        cost_estimate=pl.CostEstimate(
            flops=3 * R * C, transcendentals=0,
            bytes_accessed=R * C * itemsize),
    )(x2d)

    n_total = R * C
    mean = jnp.sum(partials[..., 0]) / n_total
    var = jnp.maximum(jnp.sum(partials[..., 1]) / n_total - mean * mean, 0.0)
    inv_std = lax.rsqrt(var + EPS)
    scalars = jnp.stack([mean, inv_std]).astype(jnp.float32)

    # Pass 2: tiled, fully parallel normalize.
    return pl.pallas_call(
        _batch_apply_kernel,
        out_shape=jax.ShapeDtypeStruct((R, C), x2d.dtype),
        grid_spec=pltpu.PrefetchScalarGridSpec(
            num_scalar_prefetch=0,
            grid=grid,
            in_specs=[pl.BlockSpec(memory_space=pltpu.MemorySpace.SMEM),
                      pl.BlockSpec((tb, C), lambda i: (i, 0))],
            out_specs=pl.BlockSpec((tb, C), lambda i: (i, 0)),
        ),
        compiler_params=pltpu.CompilerParams(
            dimension_semantics=("parallel",),
            vmem_limit_bytes=vmem_limit),
        cost_estimate=pl.CostEstimate(
            flops=2 * R * C, transcendentals=0,
            bytes_accessed=2 * R * C * itemsize),
    )(scalars, x2d)


def _normalize_batch(x):
    B, D1, D2 = x.shape
    N = D1 * D2
    total = B * N
    budget, vmem_limit = _vmem_caps()
    itemsize = x.dtype.itemsize
    per_elem = _footprint_per_elem(itemsize)

    if min(B, 8) * N * per_elem <= budget:
        x2d = x.reshape(B, N)                    # lane-dense, full planes per row
    else:
        # Huge planes: batch norm is a global reduction + elementwise op, so any
        # reshape is valid — pick a lane-dense column count (multiple of 128)
        # that divides the total element count.
        c_best = 0
        for k in range(1, 513):
            c = 128 * k
            if c * 8 * per_elem > budget:
                break
            if total % c == 0:
                c_best = c
        if c_best:
            x2d = x.reshape(total // c_best, c_best)
        else:
            # TODO(synk): no multiple-of-128 divisor of the element count; this
            # fallback may use masked lane stores when D2 < 128.
            x2d = x.reshape(B * D1, D2)
    out2d = _batch_norm_2d(x2d, budget, vmem_limit)
    return out2d.reshape(B, D1, D2)


# ---------------------------------------------------------------------------
# Public wrapper (matches Normalize2d.forward semantics).
# ---------------------------------------------------------------------------

def normalize2d(x, norm_type="instance"):
    """x: [B, D1, D2] -> [B, D1, D2]."""
    if x.ndim != 3:
        raise ValueError(f"expected 3D input [batch, dim1, dim2], got {x.shape}")
    if norm_type == "instance":
        return _normalize_instance(x)
    elif norm_type == "batch":
        # TODO(synk): BatchNorm2d running_mean/running_var buffer updates are not
        # emitted (normalization-only forward, as in the original module's output).
        return _normalize_batch(x)
    else:
        raise ValueError(f"unknown norm_type: {norm_type}")


# ---------------------------------------------------------------------------
# References & test.
# ---------------------------------------------------------------------------

def _ref_instance(x):
    xf = x.astype(jnp.float32)
    mean = jnp.mean(xf, axis=(1, 2), keepdims=True)
    var = jnp.mean((xf - mean) ** 2, axis=(1, 2), keepdims=True)
    return ((xf - mean) * lax.rsqrt(var + EPS)).astype(x.dtype)


def _ref_batch(x):
    xf = x.astype(jnp.float32)
    mean = jnp.mean(xf)
    var = jnp.mean((xf - mean) ** 2)
    return ((xf - mean) * lax.rsqrt(var + EPS)).astype(x.dtype)


if __name__ == "__main__":
    key = jax.random.PRNGKey(0)
    shapes = [(2, 16, 16), (3, 24, 40)]
    for i, (B, D1, D2) in enumerate(shapes):
        k = jax.random.fold_in(key, i)
        x = jax.random.normal(k, (B, D1, D2), dtype=jnp.float32) * 3.0 + 1.5

        out_i = jax.block_until_ready(normalize2d(x, norm_type="instance"))
        ref_i = _ref_instance(x)
        assert out_i.shape == (B, D1, D2)
        assert jnp.allclose(out_i, ref_i, atol=2e-4, rtol=2e-4), "instance mismatch"

        out_b = jax.block_until_ready(normalize2d(x, norm_type="batch"))
        ref_b = _ref_batch(x)
        assert out_b.shape == (B, D1, D2)
        assert jnp.allclose(out_b, ref_b, atol=2e-4, rtol=2e-4), "batch mismatch"

    # Exercise the large-plane / ragged fallback paths at small shapes by
    # forcing a tiny per-step block budget.
    _, vmem_limit = _vmem_caps()

    B, D1, D2 = 3, 24, 40
    x = jax.random.normal(jax.random.fold_in(key, 7), (B, D1, D2),
                          dtype=jnp.float32) * 2.0 - 0.5
    out_tp = jax.block_until_ready(
        _instance_norm_two_phase(x.reshape(B, D1 * D2), 1, vmem_limit)
    ).reshape(B, D1, D2)
    assert jnp.allclose(out_tp, _ref_instance(x), atol=2e-4, rtol=2e-4), \
        "instance two-phase mismatch"

    x2d = jax.random.normal(jax.random.fold_in(key, 8), (17, 256),
                            dtype=jnp.float32) + 0.3
    out_bt = jax.block_until_ready(_batch_norm_2d(x2d, 1, vmem_limit))
    assert jnp.allclose(out_bt, _ref_batch(x2d), atol=2e-4, rtol=2e-4), \
        "batch tiled/ragged mismatch"

    print("KERNEL_OK")
</pallas_src>

<mosaic_0001>
module attributes {stable_mosaic.version = 11 : i64} {
  func.func @_instance_norm_flat_kernel(%arg0: i32, %arg1: memref<2x256xf32, #tpu.memory_space<vmem>>, %arg2: memref<2x256xf32, #tpu.memory_space<vmem>>) attributes {dimension_semantics = [#tpu.dimension_semantics<parallel>], iteration_bounds = array<i64: 1>, scalar_prefetch = 0 : i64, scratch_operands = 0 : i64, tpu.core_type = #tpu.core_type<tc>, window_params = [{transform_indices = @transform_0, window_bounds = array<i64: 2, 256>}, {transform_indices = @transform_1, window_bounds = array<i64: 2, 256>}]} {
    %c0 = arith.constant 0 : index
    %c0_0 = arith.constant 0 : index
    %0 = vector.load %arg1[%c0, %c0_0] : memref<2x256xf32, #tpu.memory_space<vmem>>, vector<2x256xf32>
    %cst = arith.constant dense<0.000000e+00> : vector<2xf32>
    %1 = vector.multi_reduction <add>, %0, %cst [1] : vector<2x256xf32> to vector<2xf32>
    %2 = vector.shape_cast %1 : vector<2xf32> to vector<2x1xf32>
    %3 = arith.mulf %0, %0 : vector<2x256xf32>
    %cst_1 = arith.constant dense<0.000000e+00> : vector<2xf32>
    %4 = vector.multi_reduction <add>, %3, %cst_1 [1] : vector<2x256xf32> to vector<2xf32>
    %5 = vector.shape_cast %4 : vector<2xf32> to vector<2x1xf32>
    %cst_2 = arith.constant 3.906250e-03 : f32
    %6 = vector.broadcast %cst_2 : f32 to vector<2x1xf32>
    %7 = arith.mulf %2, %6 : vector<2x1xf32>
    %cst_3 = arith.constant 3.906250e-03 : f32
    %8 = vector.broadcast %cst_3 : f32 to vector<2x1xf32>
    %9 = arith.mulf %5, %8 : vector<2x1xf32>
    %10 = arith.mulf %7, %7 : vector<2x1xf32>
    %11 = arith.subf %9, %10 : vector<2x1xf32>
    %cst_4 = arith.constant 0.000000e+00 : f32
    %12 = vector.broadcast %cst_4 : f32 to vector<2x1xf32>
    %13 = arith.maximumf %11, %12 : vector<2x1xf32>
    %14 = vector.broadcast %7 : vector<2x1xf32> to vector<2x256xf32>
    %15 = arith.subf %0, %14 : vector<2x256xf32>
    %cst_5 = arith.constant 9.99999974E-6 : f32
    %16 = vector.broadcast %cst_5 : f32 to vector<2x1xf32>
    %17 = arith.addf %13, %16 : vector<2x1xf32>
    %18 = math.rsqrt %17 : vector<2x1xf32>
    %19 = vector.broadcast %18 : vector<2x1xf32> to vector<2x256xf32>
    %20 = arith.mulf %15, %19 : vector<2x256xf32>
    %c0_6 = arith.constant 0 : index
    %c0_7 = arith.constant 0 : index
    %21 = vector.load %arg2[%c0_6, %c0_7] : memref<2x256xf32, #tpu.memory_space<vmem>>, vector<2x256xf32>
    tpu.vector_store %arg2[%c0_6, %c0_7], %20 {strides = array<i32>} : memref<2x256xf32, #tpu.memory_space<vmem>>, vector<2x256xf32>,
    return
  }
  func.func @transform_0(%arg0: i32) -> (i32, i32) {
    %c0_i32 = arith.constant 0 : i32
    %c0_i32_0 = arith.constant 0 : i32
    return %arg0, %c0_i32 : i32, i32
  }
  func.func @transform_1(%arg0: i32) -> (i32, i32) {
    %c0_i32 = arith.constant 0 : i32
    %c0_i32_0 = arith.constant 0 : i32
    return %arg0, %c0_i32 : i32, i32
  }
}

</mosaic_0001>

<bundles_post_ra>
// kernel: tpu_custom_call.1
= control target key start
LH: loop header
LB: loop body
LE: loop exit
PB: predicated region body
PF: predicated region fallthrough
CT: control target
= control target key end

     0   :  { %6 = vsyncpa [#allocation3], 0  ;;  %s191_s0 = inlined_call_operand.hbm [shape: f32[2,256], index: 0, kind: input, shape index: {}]   ;;  %s192_s1 = inlined_call_operand.hbm [shape: f32[2,256], index: 1, kind: output, shape index: {}]  }
   0x1   :  { %7 = vsyncpa [#allocation4], 0  ;;  %s153_s6 = smov [#allocation2]   ;;  %s105_s10 = scalar_lea.hbm %s191_s0, 64 }
   0x2   :  { %s14_s7 = sshll.u32 %s153_s6, 4  ;;  %p106_p0 = scmp.ne.s32.totalorder %s191_s0, %s105_s10  ;;  %s15_s7 = int_to_ptr.vmem [resolvable:$true] %s14_s7 }
   0x3   :  { %p109_p1 = scmp.lt.u32.totalorder %s105_s10, %s191_s0 }
   0x5   :  { %p111_p2 = pnand %p109_p1, %p106_p0 }
   0x7   :  { %114 = shalt.err (!%p111_p2)
}
   0x8   :  { %s115_s15 = scalar_lea.vmem %s15_s7, 64  ;;  %p120_p4 = scmp.lt.s32.totalorder %s15_s7, %s15_s7 }
   0x9   :  { %p116_p3 = scmp.ne.s32.totalorder %s15_s7, %s115_s15  ;;  %p121_p5 = scmp.lt.s32.totalorder %s115_s15, %s115_s15 }
   0xb   :  { %p122_p6 = por %p121_p5, %p120_p4 }
   0xd   :  { %p123_p7 = pnand %p122_p6, %p116_p3 }
   0xf   :  { %126 = shalt.err (!%p123_p7)
}
  0x10   :  { %17 = dma.hbm_to_vmem [thread:$0]  %s191_s0, 64, %s15_s7, [#allocation3]  }
  0x11   :  { %149 = dma.done.wait [#allocation3], 64  }
  0x12   :  { %150 = vsyncadd [#allocation3], 4294967232  ;;  %v26_v0 = vlaneseq  ;;  %v154_v1 = vmov 1983009808   ;;  %v21_v6 = vld [vmem:[#allocation2] sm:$0xf] }
  0x13   :  { %v24_v2 = vunpack.c.l.s4 %v154_v1  ;;  %vm33_vm0 = vcmask 1041408   ;;  %v39_v8 = vmul.f32 %v21_v6, %v21_v6  ;;  %v155_v24 = vmov 269488144   ;;  %s156_s0 = smov [#allocation5]  }
  0x14   :  { %v27_v3 = vshrl.u32 %v26_v0, 7  ;;  %v63_v25 = vunpack.c.l.s4 %v155_v24  ;;  %s90_s18 = sshll.u32 %s156_s0, 4  ;;  %s91_s18 = int_to_ptr.vmem [resolvable:$true] %s90_s18 }
  0x15   :  { %v25_v4 = vunpack.c.0.s8 %v24_v2  ;;  %s127_s19 = scalar_lea.vmem %s91_s18, 64  ;;  %p132_p9 = scmp.lt.s32.totalorder %s91_s18, %s91_s18 }
  0x16   :  { %v64_v28 = vunpack.c.0.s8 %v63_v25  ;;  %p128_p8 = scmp.ne.s32.totalorder %s91_s18, %s127_s19  ;;  %p133_p10 = scmp.lt.s32.totalorder %s127_s19, %s127_s19 }
  0x17   :  { %v28_v5 = vsub.s32 %v25_v4, %v27_v3 }
  0x18   :  { %v67_v29 = vsub.s32 %v64_v28, %v27_v3  ;;  %p134_p11 = por %p133_p10, %p132_p9 }
  0x19   :  { %v29_v7 = vrot.slane %v21_v6, %v28_v5  ;;  %v47_v11 = vrot.slane %v39_v8, %v28_v5 }
  0x1a   :  { %p135_p12 = pnand %p134_p11, %p128_p8 }
  0x1b   :  { %v30_v9 = vcombine.high %v29_v7, %v29_v7  ;;  %v34_v10 = vsel %vm33_vm0, %v29_v7, 0.0  ;;  %v48_v13 = vcombine.high %v47_v11, %v47_v11  ;;  %v51_v14 = vsel %vm33_vm0, %v47_v11, 0.0 }
  0x1d   :  { %v35_v12 = vsel %vm33_vm0, %v30_v9, 0.0  ;;  %v52_v16 = vsel %vm33_vm0, %v48_v13, 0.0 }
  0x1e   :  { %v36_v15 = vadd.f32 %v35_v12, %v34_v10  ;;  %v53_v17 = vadd.f32 %v52_v16, %v51_v14 }
  0x20   :  { %37 = vadd.xlane.f32.xlu0 %v36_v15 }
  0x24   :  { %54 = vadd.xlane.f32.xlu0 %v53_v17 }
  0xad   :  { %v38_v18 = vpop.xlane.xlu0 %37 }
  0xae   :  { %v56_v19 = vmul.f32 0.00390625, %v38_v18 }
  0xb0   :  { %v58_v21 = vmul.f32 %v56_v19, %v56_v19  ;;  %v68_v30 = vrot.slane %v56_v19, %v67_v29 }
  0xb1   :  { %v55_v20 = vpop.xlane.xlu0 %54 }
  0xb2   :  { %v57_v22 = vmul.f32 0.00390625, %v55_v20  ;;  %v70_v32 = vsub.f32 %v21_v6, %v68_v30 }
  0xb4   :  { %v59_v23 = vsub.f32 %v57_v22, %v58_v21 }
  0xb6   :  { %v60_v26 = vmax.f32 %v59_v23, 0.0 }
  0xb8   :  { %v71_v27 = vadd.f32 1e-05, %v60_v26 }
  0xba   :  { %103 = vrsqrt.f32 %v71_v27 }
  0xc4   :  { %v104_v31 = vpop.eup %103 }
  0xc5   :  { %v80_v33 = vrot.slane %v104_v31, %v67_v29 }
  0xc7   :  { %v82_v34 = vmul.f32 %v80_v33, %v70_v32 }
  0xc9   :  { %83 = vst [vmem:[#allocation5] sm:$0xf] %v82_v34 }
  0xca   :  { %138 = shalt.err (!%p135_p12)
}
  0xcb   :  { %s139_s22 = scalar_lea.hbm %s192_s1, 64 }
  0xcc   :  { %p140_p13 = scmp.ne.s32.totalorder %s192_s1, %s139_s22  ;;  %p143_p0 = scmp.lt.u32.totalorder %s139_s22, %s192_s1 }
  0xce   :  { %p145_p1 = pnand %p143_p0, %p140_p13 }
  0xd0   :  { %148 = shalt.err (!%p145_p1)
}
  0xd1   :  { %93 = dma.vmem_to_hbm [thread:$0]  %s91_s18, 64, %s192_s1, [#allocation4]  }
  0xd2   :  { %151 = dma.done.wait [#allocation4], 64  }
  0xd3   :  { %152 = vsyncadd [#allocation4], 4294967232 }
  0xd4   :  { %97 = vsyncpa [#allocation3], 1 }
  0xd5   :  { %98 = vsyncpa [#allocation4], 1 }

</bundles_post_ra>
